<compile_context>
chip_gen: v5e
topology: v5e:2x2
jax: 0.10.0
libtpu: 0.0.40
codegen_flags: <defaults>
</compile_context>

<pallas_src>
import functools

import numpy as np
import jax
import jax.numpy as jnp
from jax import lax
from jax.experimental import pallas as pl
from jax.experimental.pallas import tpu as pltpu

EPS = 1e-6

_VMEM_CEIL = 48 * 1024 * 1024      # request ceiling (safe on v7x: 64 MiB phys)
_FUSED_BUDGET = 20 * 1024 * 1024   # per-batch residency budget for fused path
_TILED_BUDGET = 24 * 1024 * 1024   # per-grid-step budget for the tiled path


# ----------------------------------------------------------------------------
# fused path: one grid step per batch, x[b] resident in VMEM, read once
# ----------------------------------------------------------------------------
def _fused_kernel(x_ref, wkv_ref, bkv_ref, wq_ref, bq_ref, gamma_ref, o_ref, *,
                  C, n_total, eps):
    x = x_ref[0]                                                # (C, N)
    x_bf = x.astype(jnp.bfloat16)
    # Fused [Wv ; Wk] projection: one bf16 MXU matmul gives [V ; K].
    proj = jnp.dot(wkv_ref[...], x_bf,
                   preferred_element_type=jnp.float32) + bkv_ref[...]
    v = proj[:C, :]                                             # (C, N)
    k = proj[C:, :]                                             # (Cq, N)
    kn = k * lax.rsqrt(jnp.sum(k * k, axis=0, keepdims=True))   # l2_norm (EUP)
    # f32 contractions: kernel is HBM-bound, MXU has slack.
    mt = lax.dot_general(v, kn, (((1,), (1,)), ((), ())),
                         preferred_element_type=jnp.float32)    # (C, Cq)
    vsum = jnp.sum(v, axis=1, keepdims=True)                    # (C, 1)
    ksum = jnp.sum(kn, axis=1, keepdims=True) + eps             # (Cq, 1)

    q = jnp.dot(wq_ref[...], x_bf,
                preferred_element_type=jnp.float32) + bq_ref[...]
    qn = q * lax.rsqrt(jnp.sum(q * q, axis=0, keepdims=True))   # (Cq, N)

    msum = jnp.dot(mt, qn, preferred_element_type=jnp.float32) + vsum
    denom = n_total + jnp.sum(ksum * qn, axis=0, keepdims=True)  # (1, N)
    scale = gamma_ref[0, 0] * pl.reciprocal(denom, approx=True)
    o_ref[0] = (x.astype(jnp.float32) + msum * scale).astype(o_ref.dtype)


# ----------------------------------------------------------------------------
# two-pass path, pass 1: accumulate per-batch statistics over spatial tiles
# ----------------------------------------------------------------------------
def _stats_kernel(x_ref, w_ref, b_ref, mt_ref, vsum_ref, ksum_ref, *,
                  C, Cq, tn, n_valid, eps, mask_tail):
    t = pl.program_id(1)

    @pl.when(t == 0)
    def _init():
        mt_ref[0] = jnp.zeros((C, Cq), jnp.float32)
        vsum_ref[0] = jnp.zeros((C, 1), jnp.float32)
        # eps folded into the k_sum accumulator at init time.
        ksum_ref[0] = jnp.full((Cq, 1), eps, jnp.float32)

    # Fused [Wv ; Wk] projection: one bf16 MXU matmul gives [V ; K].
    proj = jnp.dot(w_ref[...], x_ref[0].astype(jnp.bfloat16),
                   preferred_element_type=jnp.float32) + b_ref[...]
    v = proj[:C, :]                                             # (C, tn)
    k = proj[C:, :]                                             # (Cq, tn)
    kn = k * lax.rsqrt(jnp.sum(k * k, axis=0, keepdims=True))   # l2_norm

    def accumulate(v_t, kn_t):
        # f32 contractions (no bf16 accumulation error across tiles).
        mt_ref[0] += lax.dot_general(v_t, kn_t, (((1,), (1,)), ((), ())),
                                     preferred_element_type=jnp.float32)
        vsum_ref[0] += jnp.sum(v_t, axis=1, keepdims=True)
        ksum_ref[0] += jnp.sum(kn_t, axis=1, keepdims=True)

    if mask_tail:
        last = pl.num_programs(1) - 1

        @pl.when(t == last)
        def _ragged():                                          # mask padded cols
            col = t * tn + lax.broadcasted_iota(jnp.int32, (1, tn), 1)
            keep = col < n_valid
            accumulate(jnp.where(keep, v, 0.0), jnp.where(keep, kn, 0.0))

        @pl.when(t != last)
        def _full():
            accumulate(v, kn)
    else:
        accumulate(v, kn)


# ----------------------------------------------------------------------------
# two-pass path, pass 2: per-tile Q projection + apply
# ----------------------------------------------------------------------------
def _apply_kernel(x_ref, wq_ref, bq_ref, mt_ref, vsum_ref, ksum_ref, gamma_ref,
                  o_ref, *, n_total, tn, n_valid, mask_tail):
    x = x_ref[0]                                                # (C, tn)
    q = jnp.dot(wq_ref[...], x.astype(jnp.bfloat16),
                preferred_element_type=jnp.float32) + bq_ref[...]
    qn = q * lax.rsqrt(jnp.sum(q * q, axis=0, keepdims=True))   # (Cq, tn)
    if mask_tail:
        # NaN hygiene only: padded columns would hit rsqrt(0); their stores
        # are dropped by the partial output block anyway.
        col = pl.program_id(1) * tn + lax.broadcasted_iota(jnp.int32, (1, tn), 1)
        qn = jnp.where(col < n_valid, qn, 0.0)
    # matrix_sum = value_sum + matrix^T @ Qn ;  denom = N + (k_sum+eps) . Qn
    msum = jnp.dot(mt_ref[0], qn, preferred_element_type=jnp.float32) + vsum_ref[0]
    denom = n_total + jnp.sum(ksum_ref[0] * qn, axis=0, keepdims=True)
    scale = gamma_ref[0, 0] * pl.reciprocal(denom, approx=True)
    o_ref[0] = (x.astype(jnp.float32) + msum * scale).astype(o_ref.dtype)


# ----------------------------------------------------------------------------
# wrapper
# ----------------------------------------------------------------------------
def _fused_vmem_bytes(C, Cq, N, itemsize):
    return (4 * C * N * itemsize      # x + out blocks, double-buffered
            + 2 * C * N               # bf16 cast of x
            + 4 * (C + Cq) * N        # f32 projection
            + 4 * C * N               # matrix_sum
            + 16 * Cq * N             # q / qn / k / kn
            + 4 * (C + 2 * Cq) * C    # weights (bf16, double-buffered)
            + (2 << 20))              # headroom


def _pick_tn(C, Cq, N, block_n, budget_bytes):
    n128 = -(-N // 128) * 128
    tn = max(128, min((block_n // 128) * 128, n128))
    # conservative per-column VMEM bytes (max over pass 1 / pass 2), including
    # the f32 projection intermediate and double-buffered x / out tiles.
    per_col = max(14 * C + 16 * Cq, 22 * C + 12 * Cq) + 64
    fixed = 4 * (C + 2 * Cq) * C + (2 << 20)
    while tn > 128 and tn * per_col + fixed > budget_bytes:
        tn -= 128
    return tn, tn * per_col + fixed


def _compiler_params(dim_semantics, vmem_estimate):
    limit = int(min(_VMEM_CEIL, max(32 * 1024 * 1024, int(1.5 * vmem_estimate))))
    return pltpu.CompilerParams(dimension_semantics=dim_semantics,
                                vmem_limit_bytes=limit)


@functools.partial(jax.jit, static_argnames=("block_n", "force_two_pass"))
def position_linear_attention(x, params, *, block_n=2048, force_two_pass=False):
    """Forward pass of PositionLinearAttention. x is NCHW."""
    B, C, H, W = x.shape
    N = H * W
    Cq = params["wq"].shape[0]

    x_flat = x.reshape(B, C, N)       # layout-preserving reshape, no HBM pass

    # Fused [Wv ; Wk] weights (bf16 MXU operands, f32 biases).  Weight-side
    # prep only — negligible next to activation traffic.
    wkv = jnp.concatenate([params["wv"], params["wk"]], axis=0).astype(jnp.bfloat16)
    bkv = jnp.concatenate([params["bv"], params["bk"]], axis=0).astype(jnp.float32)
    wq = params["wq"].astype(jnp.bfloat16)
    bq = params["bq"].astype(jnp.float32)
    gamma = jnp.asarray(params["gamma"], jnp.float32).reshape(1, 1)

    fused_bytes = _fused_vmem_bytes(C, Cq, N, x.dtype.itemsize)
    if (not force_two_pass) and fused_bytes <= _FUSED_BUDGET:
        # ---- fused: x read from HBM exactly once per batch -----------------
        out_flat = pl.pallas_call(
            functools.partial(_fused_kernel, C=C, n_total=float(N), eps=EPS),
            out_shape=jax.ShapeDtypeStruct((B, C, N), x.dtype),
            grid=(B,),
            in_specs=[
                pl.BlockSpec((1, C, N), lambda b: (b, 0, 0)),          # x[b]
                pl.BlockSpec((C + Cq, C), lambda b: (0, 0)),           # [Wv;Wk]
                pl.BlockSpec((C + Cq, 1), lambda b: (0, 0)),           # [bv;bk]
                pl.BlockSpec((Cq, C), lambda b: (0, 0)),               # Wq
                pl.BlockSpec((Cq, 1), lambda b: (0, 0)),               # bq
                pl.BlockSpec(memory_space=pltpu.MemorySpace.SMEM),     # gamma
            ],
            out_specs=pl.BlockSpec((1, C, N), lambda b: (b, 0, 0)),
            compiler_params=_compiler_params(("parallel",), fused_bytes),
        )(x_flat, wkv, bkv, wq, bq, gamma)
    else:
        # ---- two-pass tiled path -------------------------------------------
        tn, step_bytes = _pick_tn(C, Cq, N, block_n, _TILED_BUDGET)
        n_tiles = -(-N // tn)
        mask_tail = (n_tiles * tn != N)   # ragged tail handled in-kernel

        mt, vsum, ksum = pl.pallas_call(
            functools.partial(_stats_kernel, C=C, Cq=Cq, tn=tn, n_valid=N,
                              eps=EPS, mask_tail=mask_tail),
            out_shape=(
                jax.ShapeDtypeStruct((B, C, Cq), jnp.float32),
                jax.ShapeDtypeStruct((B, C, 1), jnp.float32),
                jax.ShapeDtypeStruct((B, Cq, 1), jnp.float32),
            ),
            grid=(B, n_tiles),
            in_specs=[
                pl.BlockSpec((1, C, tn), lambda b, t: (b, 0, t)),      # x tile
                pl.BlockSpec((C + Cq, C), lambda b, t: (0, 0)),        # [Wv;Wk]
                pl.BlockSpec((C + Cq, 1), lambda b, t: (0, 0)),        # [bv;bk]
            ],
            out_specs=(
                pl.BlockSpec((1, C, Cq), lambda b, t: (b, 0, 0)),      # matrix^T
                pl.BlockSpec((1, C, 1), lambda b, t: (b, 0, 0)),       # value_sum
                pl.BlockSpec((1, Cq, 1), lambda b, t: (b, 0, 0)),      # k_sum+eps
            ),
            compiler_params=_compiler_params(("parallel", "arbitrary"),
                                             step_bytes),
        )(x_flat, wkv, bkv)

        out_flat = pl.pallas_call(
            functools.partial(_apply_kernel, n_total=float(N), tn=tn,
                              n_valid=N, mask_tail=mask_tail),
            out_shape=jax.ShapeDtypeStruct((B, C, N), x.dtype),
            grid=(B, n_tiles),
            in_specs=[
                pl.BlockSpec((1, C, tn), lambda b, t: (b, 0, t)),      # x tile
                pl.BlockSpec((Cq, C), lambda b, t: (0, 0)),            # Wq
                pl.BlockSpec((Cq, 1), lambda b, t: (0, 0)),            # bq
                pl.BlockSpec((1, C, Cq), lambda b, t: (b, 0, 0)),      # matrix^T
                pl.BlockSpec((1, C, 1), lambda b, t: (b, 0, 0)),       # value_sum
                pl.BlockSpec((1, Cq, 1), lambda b, t: (b, 0, 0)),      # k_sum+eps
                pl.BlockSpec(memory_space=pltpu.MemorySpace.SMEM),     # gamma
            ],
            out_specs=pl.BlockSpec((1, C, tn), lambda b, t: (b, 0, t)),
            compiler_params=_compiler_params(("parallel", "parallel"),
                                             step_bytes),
        )(x_flat, wq, bq, mt, vsum, ksum, gamma)

    # Module does weight_value.view(B, C, height, width); for square spatial
    # dims (the usual case) this is exactly the inverse of the flatten above.
    return out_flat.reshape(B, C, H, W)


# ----------------------------------------------------------------------------
# pure-JAX reference (transliteration of the PyTorch forward) + params
# ----------------------------------------------------------------------------
def reference(x, p, eps=EPS):
    B, C, H, W = x.shape
    N = H * W
    xf = x.reshape(B, C, N).astype(jnp.float32)
    Q = jnp.einsum('oc,bcn->bon', p["wq"], xf) + p["bq"][None]
    K = jnp.einsum('oc,bcn->bon', p["wk"], xf) + p["bk"][None]
    V = jnp.einsum('oc,bcn->bon', p["wv"], xf) + p["bv"][None]
    Q = Q / jnp.linalg.norm(Q, axis=-2, keepdims=True)
    K = K / jnp.linalg.norm(K, axis=-2, keepdims=True)
    Qp = jnp.transpose(Q, (0, 2, 1))
    tailor = 1.0 / (N + jnp.einsum('bnc,bc->bn', Qp, jnp.sum(K, axis=-1) + eps))
    value_sum = jnp.einsum('bcn->bc', V)[..., None]
    matrix = jnp.einsum('bmn,bcn->bmc', K, V)
    matrix_sum = value_sum + jnp.einsum('bnm,bmc->bcn', Qp, matrix)
    wv_ = jnp.einsum('bcn,bn->bcn', matrix_sum, tailor).reshape(B, C, H, W)
    return xf.reshape(B, C, H, W) + p["gamma"].reshape(()) * wv_


def init_params(key, in_places):
    Cq = in_places // 8
    ks = jax.random.split(key, 6)
    return {
        "wq": 0.1 * jax.random.normal(ks[0], (Cq, in_places), jnp.float32),
        "bq": 0.1 * jax.random.normal(ks[1], (Cq, 1), jnp.float32),
        "wk": 0.1 * jax.random.normal(ks[2], (Cq, in_places), jnp.float32),
        "bk": 0.1 * jax.random.normal(ks[3], (Cq, 1), jnp.float32),
        "wv": 0.1 * jax.random.normal(ks[4], (in_places, in_places), jnp.float32),
        "bv": 0.1 * jax.random.normal(ks[5], (in_places, 1), jnp.float32),
        # Module inits gamma to 0 (output == x); use 1.0 so the attention
        # branch is actually exercised / checked.
        "gamma": jnp.full((1, 1), 1.0, jnp.float32),
    }


if __name__ == "__main__":
    B, C, H, W = 2, 16, 16, 16          # in_places=16 -> Cq = 2, N = 256
    key = jax.random.PRNGKey(0)
    kx, kp = jax.random.split(key)
    x = jax.random.normal(kx, (B, C, H, W), jnp.float32)
    params = init_params(kp, C)

    ref = jax.block_until_ready(reference(x, params))

    # Default path at this shape: fused single-read kernel.
    out_fused = jax.block_until_ready(position_linear_attention(x, params))
    np.testing.assert_allclose(np.asarray(out_fused), np.asarray(ref),
                               rtol=2e-2, atol=2e-2)

    # Also exercise the two-pass tiled path (block_n=128 -> 2 tiles per batch,
    # accumulate / apply structure).
    out_tiled = jax.block_until_ready(
        position_linear_attention(x, params, block_n=128, force_two_pass=True))
    np.testing.assert_allclose(np.asarray(out_tiled), np.asarray(ref),
                               rtol=2e-2, atol=2e-2)

    print("KERNEL_OK")
</pallas_src>

<mosaic_0001>
module attributes {stable_mosaic.version = 11 : i64} {
  func.func @_fused_kernel(%arg0: i32, %arg1: memref<1x16x256xf32, #tpu.memory_space<vmem>>, %arg2: memref<18x16xbf16, #tpu.memory_space<vmem>>, %arg3: memref<18x1xf32, #tpu.memory_space<vmem>>, %arg4: memref<2x16xbf16, #tpu.memory_space<vmem>>, %arg5: memref<2x1xf32, #tpu.memory_space<vmem>>, %arg6: memref<1x1xf32, #tpu.memory_space<smem>>, %arg7: memref<1x16x256xf32, #tpu.memory_space<vmem>>) attributes {dimension_semantics = [#tpu.dimension_semantics<parallel>], iteration_bounds = array<i64: 2>, scalar_prefetch = 0 : i64, scratch_operands = 0 : i64, tpu.core_type = #tpu.core_type<tc>, window_params = [{transform_indices = @transform_0, window_bounds = array<i64: 1, 16, 256>}, {pipeline_mode = #tpu.pipeline_mode<synchronous>, transform_indices = @transform_1, window_bounds = array<i64: 18, 16>}, {pipeline_mode = #tpu.pipeline_mode<synchronous>, transform_indices = @transform_2, window_bounds = array<i64: 18, 1>}, {pipeline_mode = #tpu.pipeline_mode<synchronous>, transform_indices = @transform_3, window_bounds = array<i64: 2, 16>}, {pipeline_mode = #tpu.pipeline_mode<synchronous>, transform_indices = @transform_4, window_bounds = array<i64: 2, 1>}, {transform_indices = @transform_5, window_bounds = array<i64: 1, 1>}, {transform_indices = @transform_6, window_bounds = array<i64: 1, 16, 256>}]} {
    %c0 = arith.constant 0 : index
    %c0_0 = arith.constant 0 : index
    %c0_1 = arith.constant 0 : index
    %0 = vector.load %arg1[%c0, %c0_0, %c0_1] : memref<1x16x256xf32, #tpu.memory_space<vmem>>, vector<1x16x256xf32>
    %1 = vector.shape_cast %0 : vector<1x16x256xf32> to vector<16x256xf32>
    %2 = arith.truncf %1 : vector<16x256xf32> to vector<16x256xbf16>
    %c0_2 = arith.constant 0 : index
    %c0_3 = arith.constant 0 : index
    %3 = vector.load %arg2[%c0_2, %c0_3] : memref<18x16xbf16, #tpu.memory_space<vmem>>, vector<18x16xbf16>
    %cst = arith.constant dense<0.000000e+00> : vector<18x256xf32>
    %4 = tpu.matmul %3, %2, %cst {dimension_numbers = #tpu.dot_dimension_numbers<[1], [0], [0], [1], [0, 0, 1, 1], [], []>} : vector<18x16xbf16>, vector<16x256xbf16>, vector<18x256xf32> -> vector<18x256xf32>
    %c0_4 = arith.constant 0 : index
    %c0_5 = arith.constant 0 : index
    %5 = vector.load %arg3[%c0_4, %c0_5] : memref<18x1xf32, #tpu.memory_space<vmem>>, vector<18x1xf32>
    %6 = vector.broadcast %5 : vector<18x1xf32> to vector<18x256xf32>
    %7 = arith.addf %4, %6 : vector<18x256xf32>
    %8 = vector.extract_strided_slice %7 {offsets = [0, 0], sizes = [16, 256], strides = [1, 1]} : vector<18x256xf32> to vector<16x256xf32>
    %9 = vector.extract_strided_slice %7 {offsets = [16, 0], sizes = [2, 256], strides = [1, 1]} : vector<18x256xf32> to vector<2x256xf32>
    %10 = arith.mulf %9, %9 : vector<2x256xf32>
    %cst_6 = arith.constant dense<0.000000e+00> : vector<256xf32>
    %11 = vector.multi_reduction <add>, %10, %cst_6 [0] : vector<2x256xf32> to vector<256xf32>
    %12 = vector.shape_cast %11 : vector<256xf32> to vector<1x256xf32>
    %13 = math.rsqrt %12 : vector<1x256xf32>
    %14 = vector.broadcast %13 : vector<1x256xf32> to vector<2x256xf32>
    %15 = arith.mulf %9, %14 : vector<2x256xf32>
    %cst_7 = arith.constant dense<0.000000e+00> : vector<16x2xf32>
    %16 = tpu.matmul %8, %15, %cst_7 {dimension_numbers = #tpu.dot_dimension_numbers<[1], [1], [0], [0], [0, 0, 1, 0], [], []>} : vector<16x256xf32>, vector<2x256xf32>, vector<16x2xf32> -> vector<16x2xf32>
    %cst_8 = arith.constant dense<0.000000e+00> : vector<16xf32>
    %17 = vector.multi_reduction <add>, %8, %cst_8 [1] : vector<16x256xf32> to vector<16xf32>
    %18 = vector.shape_cast %17 : vector<16xf32> to vector<16x1xf32>
    %cst_9 = arith.constant dense<0.000000e+00> : vector<2xf32>
    %19 = vector.multi_reduction <add>, %15, %cst_9 [1] : vector<2x256xf32> to vector<2xf32>
    %20 = vector.shape_cast %19 : vector<2xf32> to vector<2x1xf32>
    %cst_10 = arith.constant 9.99999997E-7 : f32
    %21 = vector.broadcast %cst_10 : f32 to vector<2x1xf32>
    %22 = arith.addf %20, %21 : vector<2x1xf32>
    %c0_11 = arith.constant 0 : index
    %c0_12 = arith.constant 0 : index
    %23 = vector.load %arg4[%c0_11, %c0_12] : memref<2x16xbf16, #tpu.memory_space<vmem>>, vector<2x16xbf16>
    %cst_13 = arith.constant dense<0.000000e+00> : vector<2x256xf32>
    %24 = tpu.matmul %23, %2, %cst_13 {dimension_numbers = #tpu.dot_dimension_numbers<[1], [0], [0], [1], [0, 0, 1, 1], [], []>} : vector<2x16xbf16>, vector<16x256xbf16>, vector<2x256xf32> -> vector<2x256xf32>
    %c0_14 = arith.constant 0 : index
    %c0_15 = arith.constant 0 : index
    %25 = vector.load %arg5[%c0_14, %c0_15] : memref<2x1xf32, #tpu.memory_space<vmem>>, vector<2x1xf32>
    %26 = vector.broadcast %25 : vector<2x1xf32> to vector<2x256xf32>
    %27 = arith.addf %24, %26 : vector<2x256xf32>
    %28 = arith.mulf %27, %27 : vector<2x256xf32>
    %cst_16 = arith.constant dense<0.000000e+00> : vector<256xf32>
    %29 = vector.multi_reduction <add>, %28, %cst_16 [0] : vector<2x256xf32> to vector<256xf32>
    %30 = vector.shape_cast %29 : vector<256xf32> to vector<1x256xf32>
    %31 = math.rsqrt %30 : vector<1x256xf32>
    %32 = vector.broadcast %31 : vector<1x256xf32> to vector<2x256xf32>
    %33 = arith.mulf %27, %32 : vector<2x256xf32>
    %cst_17 = arith.constant dense<0.000000e+00> : vector<16x256xf32>
    %34 = tpu.matmul %16, %33, %cst_17 {dimension_numbers = #tpu.dot_dimension_numbers<[1], [0], [0], [1], [0, 0, 1, 1], [], []>} : vector<16x2xf32>, vector<2x256xf32>, vector<16x256xf32> -> vector<16x256xf32>
    %35 = vector.broadcast %18 : vector<16x1xf32> to vector<16x256xf32>
    %36 = arith.addf %34, %35 : vector<16x256xf32>
    %37 = vector.broadcast %22 : vector<2x1xf32> to vector<2x256xf32>
    %38 = arith.mulf %37, %33 : vector<2x256xf32>
    %cst_18 = arith.constant dense<0.000000e+00> : vector<256xf32>
    %39 = vector.multi_reduction <add>, %38, %cst_18 [0] : vector<2x256xf32> to vector<256xf32>
    %40 = vector.shape_cast %39 : vector<256xf32> to vector<1x256xf32>
    %cst_19 = arith.constant 2.560000e+02 : f32
    %41 = vector.broadcast %cst_19 : f32 to vector<1x256xf32>
    %42 = arith.addf %41, %40 : vector<1x256xf32>
    %c0_20 = arith.constant 0 : index
    %c0_21 = arith.constant 0 : index
    %43 = memref.load %arg6[%c0_20, %c0_21] : memref<1x1xf32, #tpu.memory_space<smem>>
    %44 = tpu.reciprocal %42 {approx = true} : vector<1x256xf32> -> vector<1x256xf32>
    %45 = vector.broadcast %43 : f32 to vector<1x256xf32>
    %46 = arith.mulf %45, %44 : vector<1x256xf32>
    %47 = vector.broadcast %46 : vector<1x256xf32> to vector<16x256xf32>
    %48 = arith.mulf %36, %47 : vector<16x256xf32>
    %49 = arith.addf %1, %48 : vector<16x256xf32>
    %c0_22 = arith.constant 0 : index
    %c0_23 = arith.constant 0 : index
    %c0_24 = arith.constant 0 : index
    %50 = vector.load %arg7[%c0_22, %c0_23, %c0_24] : memref<1x16x256xf32, #tpu.memory_space<vmem>>, vector<1x16x256xf32>
    %51 = vector.shape_cast %50 : vector<1x16x256xf32> to vector<16x256xf32>
    %52 = vector.shape_cast %49 : vector<16x256xf32> to vector<1x16x256xf32>
    tpu.vector_store %arg7[%c0_22, %c0_23, %c0_24], %52 {strides = array<i32>} : memref<1x16x256xf32, #tpu.memory_space<vmem>>, vector<1x16x256xf32>,
    return
  }
  func.func @transform_0(%arg0: i32) -> (i32, i32, i32) {
    %c0_i32 = arith.constant 0 : i32
    %c0_i32_0 = arith.constant 0 : i32
    %c0_i32_1 = arith.constant 0 : i32
    return %arg0, %c0_i32, %c0_i32_0 : i32, i32, i32
  }
  func.func @transform_1(%arg0: i32) -> (i32, i32) {
    %c0_i32 = arith.constant 0 : i32
    %c0_i32_0 = arith.constant 0 : i32
    %c0_i32_1 = arith.constant 0 : i32
    return %c0_i32, %c0_i32_0 : i32, i32
  }
  func.func @transform_2(%arg0: i32) -> (i32, i32) {
    %c0_i32 = arith.constant 0 : i32
    %c0_i32_0 = arith.constant 0 : i32
    %c0_i32_1 = arith.constant 0 : i32
    return %c0_i32, %c0_i32_0 : i32, i32
  }
  func.func @transform_3(%arg0: i32) -> (i32, i32) {
    %c0_i32 = arith.constant 0 : i32
    %c0_i32_0 = arith.constant 0 : i32
    %c0_i32_1 = arith.constant 0 : i32
    return %c0_i32, %c0_i32_0 : i32, i32
  }
  func.func @transform_4(%arg0: i32) -> (i32, i32) {
    %c0_i32 = arith.constant 0 : i32
    %c0_i32_0 = arith.constant 0 : i32
    %c0_i32_1 = arith.constant 0 : i32
    return %c0_i32, %c0_i32_0 : i32, i32
  }
  func.func @transform_5(%arg0: i32) -> (i32, i32) {
    %c0_i32 = arith.constant 0 : i32
    %c0_i32_0 = arith.constant 0 : i32
    %c0_i32_1 = arith.constant 0 : i32
    return %c0_i32, %c0_i32_0 : i32, i32
  }
  func.func @transform_6(%arg0: i32) -> (i32, i32, i32) {
    %c0_i32 = arith.constant 0 : i32
    %c0_i32_0 = arith.constant 0 : i32
    %c0_i32_1 = arith.constant 0 : i32
    return %arg0, %c0_i32, %c0_i32_0 : i32, i32, i32
  }
}

</mosaic_0001>

<bundles_post_ra>
// kernel: position_linear_attention.1
= control target key start
LH: loop header
LB: loop body
LE: loop exit
PB: predicated region body
PF: predicated region fallthrough
CT: control target
= control target key end

     0   :  { %s755_s23 = smov 0   ;;  %s853_s0 = inlined_call_operand.vmem [shape: f32[2,16,256], index: 0, kind: input, shape index: {}]   ;;  %s854_s1 = inlined_call_operand.vmem [shape: bf16[18,16], index: 1, kind: input, shape index: {}]   ;;  %s855_s2 = inlined_call_operand.vmem [shape: f32[18,1], index: 2, kind: input, shape index: {}]   ;;  %s856_s3 = inlined_call_operand.vmem [shape: bf16[2,16], index: 3, kind: input, shape index: {}]   ;;  %s857_s4 = inlined_call_operand.vmem [shape: f32[2,1], index: 4, kind: input, shape index: {}]   ;;  %s858_s5 = inlined_call_operand.<no memory space> [shape: f32[1,1], index: 5, kind: input, shape index: {}]   ;;  %s859_s6 = inlined_call_operand.vmem [shape: f32[2,16,256], index: 6, kind: output, shape index: {}]  }
   0x1   :  { %11 = sst [smem:[#allocation2]] %s858_s5 }
   0x2 LB: > { %s653_s24 = sadd.s32 4294967295, %s714_s23   ;;  %p657_p0 = scmp.ge.s32.totalorder %s714_s23, 1  ;;  %s714_s23 = sphi %s755_s23, %s17_s23  }
   0x3   : > { %p213_p1 = scmp.lt.s32.totalorder %s714_s23, 3 }
   0x5   : > { %p214_p2 = pnand %p657_p0, %p213_p1 }
   0x6   : > { %p243_p3 = scmp.lt.s32.totalorder (!%p214_p2), %s653_s24, 1  ;;  %s580_s18 = sld [smem:[#allocation2]] (!%p214_p2) }
   0x7   : > { %217 = sbr.rel (%p214_p2) target bundleno = 530 (0x212), region = 44 }
   0xc   : > { %v265_v0 = vld [vmem:[%s855_s2 + $0x10] sm:$0x3]  ;;  %v716_v1 = vmov 0   ;;  %v264_v2 = vld [vmem:[%s855_s2 + $0x8] sm:$0xff]  ;;  %s861_s24 = smov (!%p243_p3, %s653_s24), 1  ;;  %v263_v8 = vld [vmem:[%s855_s2] sm:$0xff] }
   0xd   : > { %694 = vset.pattern.permute.xlu0 %v716_v1  ;;  %695 = vset.pattern.permute.xlu1 %v716_v1  ;;  %s680_s28 = sshll.u32 %s861_s24, 5  ;;  %v682_v10 = vld [vmem:[%s854_s1] sm:$0xff]  ;;  %vm289_vm0 = vcmask 130048   ;;  %v262_v12 = vld [vmem:[%s854_s1 + $0x8] sm:$0x1]  ;;  %vm334_vm1 = vcmask 1041408  }
   0xe   : > { %278 = vperm.xlu0 %694, %v265_v0   ;;  %273 = vperm.xlu1 %695, %v264_v2   ;;  %s247_s7 = scalar_lea.vmem %s853_s0, %s680_s28  ;;  %v430_v11 = vld [vmem:[%s857_s4] sm:$0x3]  ;;  %v286_v13 = vunpack.c.l.b16 %v262_v12  ;;  %vm503_vm14 = vcmask 15360   ;;  %s252_s21 = scalar_lea.vmem %s859_s6, %s680_s28 }
   0xf   : > { %v777_v3 = vld [vmem:[%s247_s7] sm:$0xff]  ;;  %v779_v4 = vld [vmem:[%s247_s7 + $0x10] sm:$0xff]  ;;  %v781_v5 = vld [vmem:[%s247_s7 + $0x8] sm:$0xff] }
  0x10   : > { %v785_v6 = vpack.c.bf16 %v779_v4, %v777_v3  ;;  %v787_v7 = vld [vmem:[%s247_s7 + $0x18] sm:$0xff]  ;;  %v288_v14 = vpack.c.b16 %v286_v13, %v286_v13 }
  0x11   : > { %v794_v9 = vpack.c.bf16 %v787_v7, %v781_v5 }
  0x12   : > { %303 = vmatpush.bf16.msra.mxu0 %v785_v6 }
  0x13   : > { %321 = vmatpush.bf16.msra.mxu1 %v794_v9 }
  0x15   : > { %666 = vmatmul.msk.bf16.vlgmr.msra.gmra.mxu0 %vm289_vm0, %v682_v10 }
  0x16   : > { %268 = vperm.xlu0 %694, %v263_v8   ;;  %433 = vperm.xlu1 %695, %v430_v11   ;;  %v429_v11 = vld [vmem:[%s856_s3] sm:$0x1] }
  0x17   : > { %668 = vmatmul.msk.bf16.vlgmr.msra.gmra.mxu1 %vm289_vm0, %v682_v10 }
  0x25   : > { %667 = vmatmul.msk.bf16.gmra.mxu0 %vm289_vm0, %v288_v14 }
  0x27   : > { %669 = vmatmul.msk.bf16.gmra.mxu1 %vm289_vm0, %v288_v14 }
  0x80   : > { %v274_v17 = vpop.permute.xlu1 %273  ;;  %v279_v23 = vpop.permute.xlu0 %278 }
  0x88   : > { %v269_v59 = vpop.permute.xlu0 %268  ;;  %v434_v14 = vpop.permute.xlu1 %433 }
  0x92   : > { %v305_v15 = vpop.f32.mrf.mxu0 }
  0x93   : > { %v306_v0 = vadd.f32 %v305_v15, %v269_v59 }
  0x94   : > { %v811_v16 = vpop.f32.mrf.mxu1 }
  0x95   : > { %v324_v2 = vadd.f32 %v811_v16, %v269_v59 }
  0x97   : > { %v417_v10 = vadd.f32 %v324_v2, %v306_v0 }
  0x9a   : > { %v307_v18 = vpop.f32.mrf.mxu0 }
  0x9b   : > { %v813_v19 = vadd.f32 %v307_v18, %v274_v17 }
  0x9c   : > { %v325_v20 = vpop.f32.mrf.mxu1 }
  0x9d   : > { %v815_v21 = vadd.f32 %v325_v20, %v274_v17 }
  0x9f   : > { %v420_v22 = vadd.f32 %v815_v21, %v813_v19 }
  0xa1   : > { %421 = vadd.xlane.f32.xlu0 %v420_v22 }
  0xa2   : > { %v310_v24 = vpop.f32.mrf.mxu0 }
  0xa3   : > { %v311_v25 = vadd.f32 %v310_v24, %v279_v23 }
  0xa4   : > { %v328_v26 = vpop.f32.mrf.mxu1 }
  0xa5   : > { %v329_v27 = vadd.f32 %v328_v26, %v279_v23  ;;  %v332_v28 = vmul.f32 %v311_v25, %v311_v25 }
  0xa7   : > { %v333_v29 = vmul.f32 %v329_v27, %v329_v27  ;;  %v335_v30 = vsel %vm334_vm1, %v332_v28, 0.0 }
  0xa8   : > { %v336_v31 = vrot.slane %v335_v30, 4 }
  0xa9   : > { %v342_v32 = vsel %vm334_vm1, %v333_v29, 0.0 }
  0xaa   : > { %v343_v33 = vrot.slane %v342_v32, 4  ;;  %v337_v34 = vadd.f32 %v336_v31, %v335_v30  ;;  %v312_v35 = vpop.f32.mrf.mxu0 }
  0xac   : > { %v344_v36 = vadd.f32 %v343_v33, %v342_v32  ;;  %v330_v37 = vpop.f32.mrf.mxu1  ;;  %v338_v38 = vrot.slane %v337_v34, 2 }
  0xae   : > { %v345_v39 = vrot.slane %v344_v36, 2  ;;  %v339_v40 = vadd.f32 %v338_v38, %v337_v34 }
  0xb0   : > { %v346_v41 = vadd.f32 %v345_v39, %v344_v36  ;;  %v340_v42 = vrot.slane %v339_v40, 1 }
  0xb2   : > { %v347_v43 = vrot.slane %v346_v41, 1  ;;  %v341_v44 = vadd.f32 %v340_v42, %v339_v40 }
  0xb4   : > { %v348_v45 = vadd.f32 %v347_v43, %v346_v41  ;;  %696 = vrsqrt.f32 %v341_v44  ;;  %vm355_vm4 = vweird.f32 %v341_v44 }
  0xb6   : > { %698 = vrsqrt.f32 %v348_v45  ;;  %vm365_vm6 = vweird.f32 %v348_v45 }
  0xba   : > { %v697_v46 = vpop.eup %696 }
  0xbb   : > { %v350_v48 = vmul.f32 %v697_v46, %v341_v44  ;;  %vm356_vm2 = vweird.f32 %v697_v46 }
  0xbc   : > { %v699_v47 = vpop.eup %698  ;;  %vm357_vm5 = vmor %vm355_vm4, %vm356_vm2 }
  0xbd   : > { %v360_v49 = vmul.f32 %v699_v47, %v348_v45  ;;  %v351_v50 = vmul.f32 %v697_v46, %v350_v48  ;;  %vm366_vm3 = vweird.f32 %v699_v47 }
  0xbe   : > { %vm367_vm7 = vmor %vm365_vm6, %vm366_vm3 }
  0xbf   : > { %v361_v51 = vmul.f32 %v699_v47, %v360_v49  ;;  %v352_v52 = vmul.f32 0.5, %v351_v50 }
  0xc1   : > { %v362_v53 = vmul.f32 0.5, %v361_v51  ;;  %v353_v54 = vsub.f32 1.5, %v352_v52 }
  0xc3   : > { %v363_v55 = vsub.f32 1.5, %v362_v53  ;;  %v354_v56 = vmul.f32 %v697_v46, %v353_v54 }
  0xc5   : > { %v364_v57 = vmul.f32 %v699_v47, %v363_v55  ;;  %v358_v58 = vsel %vm357_vm5, %v697_v46, %v354_v56 }
  0xc6   : > { %v369_v60 = vmul.f32 %v358_v58, %v311_v25 }
  0xc7   : > { %v368_v61 = vsel %vm367_vm7, %v699_v47, %v364_v57 }
  0xc8   : > { %v370_v62 = vmul.f32 %v368_v61, %v329_v27  ;;  %386 = vmatpush.xpose.msra.mxu2 %v369_v60  ;;  %v423_v63 = vsel %vm334_vm1, %v369_v60, 0.0 }
  0xca   : > { %409 = vmatpush.xpose.msra.mxu3 %v370_v62  ;;  %v424_v1 = vsel %vm334_vm1, %v370_v62, 0.0 }
  0xcb   : > { %v425_v8 = vadd.f32 %v424_v1, %v423_v63  ;;  %387 = vmatmul.f32.vlgmr.msra.gmra.mxu2 %v306_v0 }
  0xcc   : > { %446 = vmatpush.bf16.msrb.mxu2 %v785_v6 }
  0xcd   : > { %410 = vmatmul.f32.vlgmr.msra.gmra.mxu3 %v324_v2  ;;  %426 = vadd.xlane.f32.xlu2 %v425_v8 }
  0xce   : > { %459 = vmatpush.bf16.msrb.mxu3 %v794_v9 }
  0xd3   : > { %390 = vmatmul.f32.gmra.mxu2 %v813_v19 }
  0xd5   : > { %413 = vmatmul.f32.gmra.mxu3 %v815_v21  ;;  %418 = vadd.xlane.f32.xlu2 %v417_v10 }
  0xdb   : > { %670 = vmatmul.msk.bf16.vlgmr.msrb.gmra.mxu2 %vm289_vm0, %v429_v11 }
  0xdd   : > { %671 = vmatmul.msk.bf16.vlgmr.msrb.gmra.mxu3 %vm289_vm0, %v429_v11 }
 0x140   : > { %v427_v55 = vpop.xlane.xlu2 %426 }
 0x141   : > { %v428_v56 = vadd.f32 1e-06, %v427_v55 }
 0x14e   : > { %v388_v6 = vpop.f32.mrf.mxu2 }
 0x150   : > { %v411_v12 = vpop.f32.mrf.mxu3 }
 0x151   : > { %v412_v53 = vadd.f32 %v411_v12, %v388_v6 }
 0x156   : > { %v391_v9 = vpop.f32.mrf.mxu2 }
 0x158   : > { %v414_v13 = vpop.f32.mrf.mxu3 }
 0x159   : > { %v415_v54 = vadd.f32 %v414_v13, %v391_v9 }
 0x15e   : > { %v448_v15 = vpop.f32.mrf.mxu2 }
 0x15f   : > { %v449_v16 = vadd.f32 %v448_v15, %v434_v14 }
 0x160   : > { %v461_v17 = vpop.f32.mrf.mxu3 }
 0x161   : > { %v462_v18 = vadd.f32 %v461_v17, %v434_v14  ;;  %v465_v19 = vmul.f32 %v449_v16, %v449_v16 }
 0x163   : > { %v466_v20 = vmul.f32 %v462_v18, %v462_v18  ;;  %v467_v21 = vsel %vm334_vm1, %v465_v19, 0.0 }
 0x164   : > { %v468_v22 = vrot.slane %v467_v21, 4 }
 0x165   : > { %v474_v23 = vsel %vm334_vm1, %v466_v20, 0.0 }
 0x166   : > { %v475_v24 = vrot.slane %v474_v23, 4  ;;  %v469_v25 = vadd.f32 %v468_v22, %v467_v21  ;;  %v450_v26 = vpop.f32.mrf.mxu2 }
 0x168   : > { %v476_v27 = vadd.f32 %v475_v24, %v474_v23  ;;  %v463_v28 = vpop.f32.mrf.mxu3  ;;  %v470_v29 = vrot.slane %v469_v25, 2 }
 0x169   : > { %v422_v28 = vpop.xlane.xlu0 %421 }
 0x16a   : > { %v477_v30 = vrot.slane %v476_v27, 2  ;;  %v471_v31 = vadd.f32 %v470_v29, %v469_v25 }
 0x16c   : > { %v478_v32 = vadd.f32 %v477_v30, %v476_v27  ;;  %v472_v33 = vrot.slane %v471_v31, 1 }
 0x16e   : > { %v479_v34 = vrot.slane %v478_v32, 1  ;;  %v473_v35 = vadd.f32 %v472_v33, %v471_v31 }
 0x170   : > { %v480_v36 = vadd.f32 %v479_v34, %v478_v32  ;;  %700 = vrsqrt.f32 %v473_v35  ;;  %vm487_vm10 = vweird.f32 %v473_v35 }
 0x172   : > { %702 = vrsqrt.f32 %v480_v36  ;;  %vm497_vm12 = vweird.f32 %v480_v36 }
 0x176   : > { %v701_v37 = vpop.eup %700 }
 0x177   : > { %v482_v39 = vmul.f32 %v701_v37, %v473_v35  ;;  %vm488_vm8 = vweird.f32 %v701_v37 }
 0x178   : > { %v703_v38 = vpop.eup %702  ;;  %vm489_vm11 = vmor %vm487_vm10, %vm488_vm8 }
 0x179   : > { %v492_v40 = vmul.f32 %v703_v38, %v480_v36  ;;  %v483_v41 = vmul.f32 %v701_v37, %v482_v39  ;;  %vm498_vm9 = vweird.f32 %v703_v38 }
 0x17a   : > { %vm499_vm13 = vmor %vm497_vm12, %vm498_vm9 }
 0x17b   : > { %v493_v42 = vmul.f32 %v703_v38, %v492_v40  ;;  %v484_v43 = vmul.f32 0.5, %v483_v41 }
 0x17d   : > { %v494_v44 = vmul.f32 0.5, %v493_v42  ;;  %v485_v45 = vsub.f32 1.5, %v484_v43 }
 0x17f   : > { %v495_v46 = vsub.f32 1.5, %v494_v44  ;;  %v486_v47 = vmul.f32 %v701_v37, %v485_v45 }
 0x181   : > { %v496_v48 = vmul.f32 %v703_v38, %v495_v46  ;;  %v490_v49 = vsel %vm489_vm11, %v701_v37, %v486_v47 }
 0x182   : > { %v501_v50 = vmul.f32 %v490_v49, %v449_v16  ;;  %v583_v16 = vstv %s580_s18 }
 0x183   : > { %v500_v51 = vsel %vm499_vm13, %v703_v38, %v496_v48 }
 0x184   : > { %v502_v52 = vmul.f32 %v500_v51, %v462_v18  ;;  %672 = vmatpush.msk.msrb.mxu0 %vm334_vm1, %v501_v50  ;;  %683 = vmatpush.msk.msra.mxu2 %vm334_vm1, %v501_v50  ;;  %v562_v57 = vmul.f32 %v501_v50, %v428_v56  ;;  %v419_v18 = vpop.xlane.xlu2 %418 }
 0x185   : > { %673 = vmatmul.msk.f32.vlgmr.msrb.gmra.mxu0 %vm503_vm14, %v412_v53  ;;  %674 = vmatmul.msk.f32.vlgmr.msra.gmra.mxu2 %vm503_vm14, %v415_v54 }
 0x186   : > { %675 = vmatpush.msk.msrb.mxu1 %vm334_vm1, %v502_v52  ;;  %684 = vmatpush.msk.msra.mxu3 %vm334_vm1, %v502_v52  ;;  %v563_v58 = vmul.f32 %v502_v52, %v428_v56  ;;  %v564_v59 = vsel %vm334_vm1, %v562_v57, 0.0 }
 0x187   : > { %676 = vmatmul.msk.f32.vlgmr.msrb.gmra.mxu1 %vm503_vm14, %v412_v53  ;;  %677 = vmatmul.msk.f32.vlgmr.msra.gmra.mxu3 %vm503_vm14, %v415_v54  ;;  %v565_v61 = vrot.slane %v564_v59, 4 }
 0x188   : > { %v571_v60 = vsel %vm334_vm1, %v563_v58, 0.0 }
 0x189   : > { %v572_v62 = vrot.slane %v571_v60, 4  ;;  %v566_v63 = vadd.f32 %v565_v61, %v564_v59 }
 0x18b   : > { %v573_v0 = vadd.f32 %v572_v62, %v571_v60  ;;  %v567_v1 = vrot.slane %v566_v63, 2 }
 0x18d   : > { %v574_v2 = vrot.slane %v573_v0, 2  ;;  %v568_v8 = vadd.f32 %v567_v1, %v566_v63 }
 0x18f   : > { %v575_v10 = vadd.f32 %v574_v2, %v573_v0  ;;  %v569_v11 = vrot.slane %v568_v8, 1 }
 0x191   : > { %v576_v6 = vrot.slane %v575_v10, 1  ;;  %v570_v12 = vadd.f32 %v569_v11, %v568_v8 }
 0x193   : > { %v577_v9 = vadd.f32 %v576_v6, %v575_v10  ;;  %v578_v13 = vadd.f32 256.0, %v570_v12 }
 0x195   : > { %v579_v14 = vadd.f32 256.0, %v577_v9  ;;  %704 = vrcp.f32 %v578_v13 }
 0x197   : > { %706 = vrcp.f32 %v579_v14 }
 0x19b   : > { %v705_v15 = vpop.eup %704 }
 0x19c   : > { %v584_v21 = vmul.f32 %v705_v15, %v583_v16 }
 0x19d   : > { %v707_v17 = vpop.eup %706 }
 0x19e   : > { %v585_v24 = vmul.f32 %v707_v17, %v583_v16 }
 0x202   : > { %v533_v19 = vpop.f32.mrf.mxu0 }
 0x203   : > { %v534_v20 = vadd.f32 %v533_v19, %v419_v18 }
 0x204   : > { %v556_v22 = vpop.f32.mrf.mxu1 }
 0x205   : > { %v557_v23 = vadd.f32 %v556_v22, %v419_v18  ;;  %v586_v25 = vmul.f32 %v584_v21, %v534_v20 }
 0x207   : > { %v587_v26 = vmul.f32 %v585_v24, %v557_v23  ;;  %v590_v27 = vadd.f32 %v586_v25, %v777_v3 }
 0x208   : > { %v536_v30 = vpop.f32.mrf.mxu2 }
 0x209   : > { %v591_v29 = vadd.f32 %v587_v26, %v781_v5  ;;  %594 = vst [vmem:[%s252_s21] sm:$0xff] %v590_v27  ;;  %v537_v31 = vadd.f32 %v536_v30, %v422_v28 }
 0x20a   : > { %v559_v32 = vpop.f32.mrf.mxu3 }
 0x20b   : > { %595 = vst [vmem:[%s252_s21 + $0x8] sm:$0xff] %v591_v29  ;;  %v560_v33 = vadd.f32 %v559_v32, %v422_v28  ;;  %v588_v34 = vmul.f32 %v584_v21, %v537_v31 }
 0x20d   : > { %v589_v35 = vmul.f32 %v585_v24, %v560_v33  ;;  %v592_v36 = vadd.f32 %v588_v34, %v779_v4 }
 0x20f   : > { %v593_v37 = vadd.f32 %v589_v35, %v787_v7  ;;  %596 = vst [vmem:[%s252_s21 + $0x10] sm:$0xff] %v592_v36 }
 0x211   : > { %597 = vst [vmem:[%s252_s21 + $0x18] sm:$0xff] %v593_v37 }
 0x212 PF: > { %s17_s23 = sadd.s32 1, %s714_s23  }
 0x213   : > { %p14_p4 = scmp.ge.s32.totalorder %s17_s23, 4  }
 0x215   :  { %16 = sbr.rel (!%p14_p4) target bundleno = 2 (0x2), region = 74 }

</bundles_post_ra>
